<compile_context>
chip_gen: v7x
topology: tpu7x:2x2x1
jax: 0.10.0
libtpu: 0.0.40
codegen_flags: <defaults>
</compile_context>

<pallas_src>
import functools

import jax
import jax.numpy as jnp
from jax import lax
from jax.experimental import pallas as pl
from jax.experimental.pallas import tpu as pltpu

LANE = 128       # vreg lane width: pad last dims to this for unmasked stores
SUBLANE = 8      # vreg sublane width: pad second-to-last dims to this
NUM_CLASSES = 5

# bf16 operands on the MXU (f32 accumulation via preferred_element_type).
# The MXU is bf16-native on v5e/v6e/v7x; bf16 also halves Ahat's footprint.
MXU_DTYPE = jnp.bfloat16


def _round_up(x, m):
    return ((x + m - 1) // m) * m


def _pad2d(a, rows, cols):
    return jnp.pad(a, ((0, rows - a.shape[0]), (0, cols - a.shape[1])))


def _full_spec(shape):
    # Whole array as a single VMEM-resident block (grid-less call).
    return pl.BlockSpec(shape, lambda: (0,) * len(shape))


def _vmem_budget_bytes():
    """Per-generation VMEM budget: ~80% of physical, capped at 100 MiB.
    v5e/v6e have 128 MiB physical VMEM; v7x only 64 MiB per TensorCore, so the
    resident-Ahat regime ends much earlier there."""
    cap = 64 << 20  # conservative default = v7x per-TC VMEM
    try:
        cap = int(getattr(pltpu.get_tpu_info(), "vmem_capacity_bytes", cap))
    except Exception:
        pass
    return min(int(cap * 0.8), 100 << 20)


# ------------------------- fused resident kernel -----------------------------

def _fused_dna_kernel(ahat_ref, x_ref, w0_ref, b0_ref, wh_ref, bh_ref,
                      pool_ref, w1_ref, b1_ref, w2_ref, b2_ref,
                      out_ref, h_ref, *, num_hidden_layers, reassociate_l0):
    f32 = jnp.float32

    # --- input GCNConv + ReLU ------------------------------------------------
    # Ahat is read straight from its bf16-at-rest VMEM block at each dot; no
    # kernel-lifetime casted copy is materialized.
    if reassociate_l0:
        # (Ahat @ X) @ W0: only pays when cdiv(Cin,128) < cdiv(H,128).
        ax = jnp.dot(ahat_ref[...], x_ref[...], preferred_element_type=f32)
        h0 = jnp.dot(ax.astype(MXU_DTYPE), w0_ref[...],
                     preferred_element_type=f32)
    else:
        xw = jnp.dot(x_ref[...], w0_ref[...], preferred_element_type=f32)
        h0 = jnp.dot(ahat_ref[...], xw.astype(MXU_DTYPE),
                     preferred_element_type=f32)
    h_ref[...] = jnp.maximum(h0 + b0_ref[...], 0.0).astype(MXU_DTYPE)

    # --- hidden GCNConv layers: h = relu(Ahat @ (h @ Wi) + bi) ---------------
    # h stays resident in bf16 VMEM scratch; unroll=True for LLO visibility.
    def layer(i, carry):
        hw = jnp.dot(h_ref[...], wh_ref[i], preferred_element_type=f32)
        h_ref[...] = jnp.maximum(
            jnp.dot(ahat_ref[...], hw.astype(MXU_DTYPE),
                    preferred_element_type=f32) + bh_ref[i], 0.0
        ).astype(MXU_DTYPE)
        return carry

    lax.fori_loop(0, num_hidden_layers, layer, 0, unroll=True)

    # --- epilogue: global mean pool + Linear/ReLU/Linear head ----------------
    g = jnp.dot(pool_ref[...], h_ref[...], preferred_element_type=f32)
    g = jnp.maximum(
        jnp.dot(g.astype(MXU_DTYPE), w1_ref[...], preferred_element_type=f32)
        + b1_ref[...], 0.0)
    out_ref[...] = (jnp.dot(g.astype(MXU_DTYPE), w2_ref[...],
                            preferred_element_type=f32)
                    + b2_ref[...]).astype(out_ref.dtype)


# --------------------- tiled / streamed-Ahat aggregation ---------------------

def _gcn_agg_kernel(ahat_ref, hw_ref, b_ref, out_ref, acc_ref):
    """out = relu(Ahat @ hw + b), Ahat streamed in (TM, TK) tiles."""
    k = pl.program_id(1)

    @pl.when(k == 0)
    def _():
        acc_ref[...] = jnp.zeros_like(acc_ref)

    acc_ref[...] += jnp.dot(ahat_ref[...], hw_ref[...],
                            preferred_element_type=jnp.float32)

    @pl.when(k == pl.num_programs(1) - 1)
    def _():
        out_ref[...] = jnp.maximum(acc_ref[...] + b_ref[...], 0.0
                                   ).astype(out_ref.dtype)


def _ahat_stream_spec(tm, tk):
    idx = lambda i, k: (i, k)
    try:
        # Deeper buffering hides the per-tile DMA behind short bf16 MXU tiles
        # (most useful with v7x's 3.2 TB/s HBM).
        return pl.BlockSpec((tm, tk), idx, pipeline_mode=pl.Buffered(3))
    except Exception:  # pipeline_mode / Buffered unavailable: default 2-deep
        return pl.BlockSpec((tm, tk), idx)


def _gcn_agg_tiled(ahat, hw, b, *, tm, tk, vmem_limit):
    n_pad, h_pad = hw.shape
    grid = (n_pad // tm, n_pad // tk)
    return pl.pallas_call(
        _gcn_agg_kernel,
        out_shape=jax.ShapeDtypeStruct((n_pad, h_pad), MXU_DTYPE),
        grid_spec=pltpu.PrefetchScalarGridSpec(
            num_scalar_prefetch=0,
            grid=grid,
            in_specs=[
                _ahat_stream_spec(tm, tk),                       # streamed Ahat
                pl.BlockSpec((tk, h_pad), lambda i, k: (k, 0)),  # hw k-slab
                pl.BlockSpec((1, h_pad), lambda i, k: (0, 0)),   # bias
            ],
            out_specs=pl.BlockSpec((tm, h_pad), lambda i, k: (i, 0)),
            scratch_shapes=[pltpu.VMEM((tm, h_pad), jnp.float32)],
        ),
        compiler_params=pltpu.CompilerParams(
            # Row axis "parallel" lets megacore (v7x: 2 TCs) shard node rows.
            dimension_semantics=("parallel", "arbitrary"),
            vmem_limit_bytes=vmem_limit),
    )(ahat, hw, b)


# ------------------------- graph structure (cached) --------------------------

def build_gcn_adjacency(edge_index, num_nodes):
    """Dense GCN-normalized adjacency Ahat = D^{-1/2} (A + I) D^{-1/2},
    laid out so that out = Ahat @ X (messages flow src -> dst)."""
    src = edge_index[0]
    dst = edge_index[1]
    loop = jnp.arange(num_nodes, dtype=src.dtype)
    src = jnp.concatenate([src, loop])
    dst = jnp.concatenate([dst, loop])
    ones = jnp.ones(src.shape[0], dtype=jnp.float32)
    deg = jnp.zeros((num_nodes,), jnp.float32).at[dst].add(ones)
    dinv = jnp.where(deg > 0, 1.0 / jnp.sqrt(deg), 0.0)
    norm = dinv[src] * dinv[dst]
    ahat = jnp.zeros((num_nodes, num_nodes), jnp.float32).at[dst, src].add(norm)
    return ahat


def build_pool_matrix(batch, num_graphs, num_nodes):
    """P[b, i] = 1/|graph b| if node i belongs to graph b, else 0 (mean pool)."""
    counts = jnp.zeros((num_graphs,), jnp.float32).at[batch].add(1.0)
    inv = jnp.where(counts > 0, 1.0 / counts, 0.0)
    p = jnp.zeros((num_graphs, num_nodes), jnp.float32)
    p = p.at[batch, jnp.arange(num_nodes)].set(inv[batch])
    return p


def precompute_graph_structure(edge_index, batch, num_nodes, num_graphs,
                               node_multiple=SUBLANE):
    """Ahat / P depend only on topology: build, pad and cast to MXU_DTYPE ONCE.
    Invariant: padded columns of Ahat and P are zero (see module docstring).
    Use node_multiple=128 (or the streaming tile size) for large graphs that
    will take the tiled path."""
    ahat = build_gcn_adjacency(edge_index, num_nodes)
    pool = build_pool_matrix(batch, num_graphs, num_nodes)
    n_pad = _round_up(num_nodes, max(node_multiple, SUBLANE))
    g_pad = _round_up(max(num_graphs, SUBLANE), SUBLANE)
    return {
        "arrays": {
            "ahat": _pad2d(ahat, n_pad, n_pad).astype(MXU_DTYPE),
            "pool": _pad2d(pool, g_pad, n_pad).astype(MXU_DTYPE),
        },
        "num_graphs": num_graphs,
        "n_pad": n_pad,
        "g_pad": g_pad,
    }


# ------------------------------ parameters ----------------------------------

def init_params(key, in_channels, hidden_channels, num_layers):
    params = {}
    k = key

    def nxt():
        nonlocal k
        k, sub = jax.random.split(k)
        return sub

    params["gcn_w"] = [jax.random.normal(nxt(), (in_channels, hidden_channels),
                                         jnp.float32) * 0.1]
    params["gcn_b"] = [jnp.zeros((1, hidden_channels), jnp.float32)]
    for _ in range(num_layers - 1):
        params["gcn_w"].append(jax.random.normal(
            nxt(), (hidden_channels, hidden_channels), jnp.float32) * 0.1)
        params["gcn_b"].append(jnp.zeros((1, hidden_channels), jnp.float32))
    # sequence_predictor: Linear(H,H) -> ReLU -> Dropout -> Linear(H,5)
    params["mlp_w1"] = jax.random.normal(nxt(), (hidden_channels, hidden_channels),
                                         jnp.float32) * 0.1
    params["mlp_b1"] = jax.random.normal(nxt(), (1, hidden_channels), jnp.float32) * 0.1
    params["mlp_w2"] = jax.random.normal(nxt(), (hidden_channels, NUM_CLASSES),
                                         jnp.float32) * 0.1
    params["mlp_b2"] = jax.random.normal(nxt(), (1, NUM_CLASSES), jnp.float32) * 0.1
    return params


def prepare_params(params, in_channels, hidden_channels, num_layers):
    """Pad / stack / cast parameters once (lane-dense, bf16 matmul operands,
    f32 biases); reuse across calls."""
    h_pad = _round_up(hidden_channels, LANE)
    o_pad = _round_up(NUM_CLASSES, LANE)
    n_hidden = num_layers - 1

    w0 = _pad2d(params["gcn_w"][0], in_channels, h_pad).astype(MXU_DTYPE)
    b0 = _pad2d(params["gcn_b"][0], 1, h_pad)                 # f32
    if n_hidden > 0:
        wh = jnp.stack([_pad2d(w, h_pad, h_pad)
                        for w in params["gcn_w"][1:]]).astype(MXU_DTYPE)
        bh = jnp.stack([_pad2d(b, 1, h_pad) for b in params["gcn_b"][1:]])
    else:  # dummy (never read: loop trip count is 0)
        wh = jnp.zeros((1, h_pad, h_pad), MXU_DTYPE)
        bh = jnp.zeros((1, 1, h_pad), jnp.float32)
    return {
        "arrays": {
            "w0": w0, "b0": b0, "wh": wh, "bh": bh,
            "w1": _pad2d(params["mlp_w1"], h_pad, h_pad).astype(MXU_DTYPE),
            "b1": _pad2d(params["mlp_b1"], 1, h_pad),
            "w2": _pad2d(params["mlp_w2"], h_pad, o_pad).astype(MXU_DTYPE),
            "b2": _pad2d(params["mlp_b2"], 1, o_pad),
        },
        "n_hidden": n_hidden, "h_pad": h_pad, "o_pad": o_pad,
    }


# -------------------------------- forward -----------------------------------

@functools.partial(jax.jit, static_argnames=("n_hidden", "num_graphs", "vmem_limit"))
def _forward_resident(pp, gg, x, *, n_hidden, num_graphs, vmem_limit):
    n_pad = gg["ahat"].shape[0]
    g_pad = gg["pool"].shape[0]
    cin, h_pad = pp["w0"].shape
    o_pad = pp["w2"].shape[1]

    # Gate the layer-0 re-association on actual 128-lane MXU tile counts.
    reassociate_l0 = bool(pl.cdiv(cin, LANE) < pl.cdiv(h_pad, LANE))

    x_p = jnp.pad(x, ((0, n_pad - x.shape[0]), (0, 0))).astype(MXU_DTYPE)

    args = (gg["ahat"], x_p, pp["w0"], pp["b0"], pp["wh"], pp["bh"],
            gg["pool"], pp["w1"], pp["b1"], pp["w2"], pp["b2"])

    kern = functools.partial(_fused_dna_kernel,
                             num_hidden_layers=n_hidden,
                             reassociate_l0=reassociate_l0)

    out_p = pl.pallas_call(
        kern,
        out_shape=jax.ShapeDtypeStruct((g_pad, o_pad), jnp.float32),
        in_specs=[_full_spec(a.shape) for a in args],
        out_specs=_full_spec((g_pad, o_pad)),
        scratch_shapes=[pltpu.VMEM((n_pad, h_pad), MXU_DTYPE)],  # resident bf16 h
        compiler_params=pltpu.CompilerParams(vmem_limit_bytes=vmem_limit),
    )(*args)

    return out_p[:num_graphs, :NUM_CLASSES]


@functools.partial(jax.jit,
                   static_argnames=("n_hidden", "num_graphs", "tm", "tk", "vmem_limit"))
def _forward_tiled(pp, gg, x, *, n_hidden, num_graphs, tm, tk, vmem_limit):
    n_pad = gg["ahat"].shape[0]
    x_p = jnp.pad(x, ((0, n_pad - x.shape[0]), (0, 0))).astype(MXU_DTYPE)

    # Only the O(L*N^2*H) Ahat aggregation is streamed through the Pallas
    # kernel; the O(N*H^2) feature transforms and the tiny pooled MLP head run
    # in XLA (their bytes/flops are negligible next to the streamed Ahat).
    # TODO(synk): fuse the pooled MLP head into the last aggregation pallas_call.
    hw = jnp.dot(x_p, pp["w0"], preferred_element_type=jnp.float32).astype(MXU_DTYPE)
    h = _gcn_agg_tiled(gg["ahat"], hw, pp["b0"], tm=tm, tk=tk,
                       vmem_limit=vmem_limit)
    for i in range(n_hidden):
        hw = jnp.dot(h, pp["wh"][i],
                     preferred_element_type=jnp.float32).astype(MXU_DTYPE)
        h = _gcn_agg_tiled(gg["ahat"], hw, pp["bh"][i], tm=tm, tk=tk,
                           vmem_limit=vmem_limit)

    g = jnp.dot(gg["pool"], h, preferred_element_type=jnp.float32)
    g = jnp.maximum(
        jnp.dot(g.astype(MXU_DTYPE), pp["w1"], preferred_element_type=jnp.float32)
        + pp["b1"], 0.0)
    out = (jnp.dot(g.astype(MXU_DTYPE), pp["w2"], preferred_element_type=jnp.float32)
           + pp["b2"])
    return out[:num_graphs, :NUM_CLASSES]


def _estimate_resident_vmem_bytes(n_pad, g_pad, cin, h_pad, o_pad, n_hidden):
    b = jnp.dtype(MXU_DTYPE).itemsize
    total = (n_pad * n_pad * b                        # Ahat (bf16 at rest)
             + g_pad * n_pad * b                      # pool
             + n_pad * h_pad * b                      # resident h scratch
             + n_pad * cin * b                        # x
             + max(n_hidden, 1) * h_pad * h_pad * b   # stacked hidden weights
             + (cin + 2 * h_pad) * h_pad * b          # w0, w1, w2
             + 4 * (2 * h_pad + o_pad) * 4            # f32 biases
             + g_pad * o_pad * 4)                     # output
    return int(total * 1.3)                           # compiler-temporary margin


def _pick_tiles(n_pad):
    for t in (512, 256, 128):
        if n_pad % t == 0:
            return t, t
    raise ValueError(
        f"n_pad={n_pad} is not a multiple of a 128-aligned tile; build the "
        f"graph with precompute_graph_structure(..., node_multiple=128).")


def dna_graph_network_forward(pparams, graph, x, *, force_tiled=False,
                              tm=None, tk=None):
    pp, gg = pparams["arrays"], graph["arrays"]
    n_hidden = pparams["n_hidden"]
    num_graphs = graph["num_graphs"]
    n_pad = gg["ahat"].shape[0]
    g_pad = gg["pool"].shape[0]
    cin, h_pad = pp["w0"].shape
    o_pad = pp["w2"].shape[1]

    vmem_limit = _vmem_budget_bytes()
    resident_bytes = _estimate_resident_vmem_bytes(n_pad, g_pad, cin, h_pad,
                                                   o_pad, n_hidden)

    if not force_tiled and resident_bytes <= vmem_limit:
        return _forward_resident(pp, gg, x, n_hidden=n_hidden,
                                 num_graphs=num_graphs, vmem_limit=vmem_limit)

    if tm is None or tk is None:
        tm, tk = _pick_tiles(n_pad)
    return _forward_tiled(pp, gg, x, n_hidden=n_hidden, num_graphs=num_graphs,
                          tm=tm, tk=tk, vmem_limit=vmem_limit)


# ---------------------------------- main -------------------------------------

if __name__ == "__main__":
    key = jax.random.PRNGKey(0)

    in_channels = 4
    hidden_channels = 32
    num_layers = 3
    num_nodes = 16
    num_graphs = 2
    num_edges = 24

    kx, ke, kp, kx2, ke2 = jax.random.split(key, 5)

    x = jax.random.normal(kx, (num_nodes, in_channels), jnp.float32)
    edge_index = jax.random.randint(ke, (2, num_edges), 0, num_nodes, dtype=jnp.int32)
    batch = jnp.concatenate([
        jnp.zeros((num_nodes // 2,), jnp.int32),
        jnp.ones((num_nodes - num_nodes // 2,), jnp.int32),
    ])

    params = init_params(kp, in_channels, hidden_channels, num_layers)
    pparams = prepare_params(params, in_channels, hidden_channels, num_layers)
    graph = precompute_graph_structure(edge_index, batch, num_nodes, num_graphs)

    out = dna_graph_network_forward(pparams, graph, x)
    out = jax.block_until_ready(out)
    assert out.shape == (num_graphs, NUM_CLASSES), out.shape

    # Exercise the streamed/tiled-Ahat path (used once Ahat no longer fits the
    # per-generation VMEM budget) on a medium graph, and check it matches the
    # resident fused kernel.
    n2, g2, e2 = 256, 4, 1024
    x2 = jax.random.normal(kx2, (n2, in_channels), jnp.float32)
    edge2 = jax.random.randint(ke2, (2, e2), 0, n2, dtype=jnp.int32)
    batch2 = (jnp.arange(n2, dtype=jnp.int32) * g2) // n2
    graph2 = precompute_graph_structure(edge2, batch2, n2, g2, node_multiple=128)

    out_res = jax.block_until_ready(dna_graph_network_forward(pparams, graph2, x2))
    out_tile = jax.block_until_ready(
        dna_graph_network_forward(pparams, graph2, x2, force_tiled=True,
                                  tm=128, tk=128))
    assert out_res.shape == (g2, NUM_CLASSES), out_res.shape
    assert jnp.allclose(out_res, out_tile, rtol=5e-2, atol=2e-2), (
        float(jnp.max(jnp.abs(out_res - out_tile))))

    print("KERNEL_OK")
</pallas_src>

<mosaic_0001>
module attributes {stable_mosaic.version = 11 : i64} {
  func.func @_fused_dna_kernel(%arg0: memref<16x16xbf16, #tpu.memory_space<vmem>>, %arg1: memref<16x4xbf16, #tpu.memory_space<vmem>>, %arg2: memref<4x128xbf16, #tpu.memory_space<vmem>>, %arg3: memref<1x128xf32, #tpu.memory_space<vmem>>, %arg4: memref<2x128x128xbf16, #tpu.memory_space<vmem>>, %arg5: memref<2x1x128xf32, #tpu.memory_space<vmem>>, %arg6: memref<8x16xbf16, #tpu.memory_space<vmem>>, %arg7: memref<128x128xbf16, #tpu.memory_space<vmem>>, %arg8: memref<1x128xf32, #tpu.memory_space<vmem>>, %arg9: memref<128x128xbf16, #tpu.memory_space<vmem>>, %arg10: memref<1x128xf32, #tpu.memory_space<vmem>>, %arg11: memref<8x128xf32, #tpu.memory_space<vmem>>, %arg12: memref<16x128xbf16, #tpu.memory_space<vmem>>) attributes {dimension_semantics = [], scalar_prefetch = 0 : i64, scratch_operands = 1 : i64, tpu.core_type = #tpu.core_type<tc>} {
    %c0 = arith.constant 0 : index
    %c0_0 = arith.constant 0 : index
    %0 = vector.load %arg1[%c0, %c0_0] : memref<16x4xbf16, #tpu.memory_space<vmem>>, vector<16x4xbf16>
    %c0_1 = arith.constant 0 : index
    %c0_2 = arith.constant 0 : index
    %1 = vector.load %arg2[%c0_1, %c0_2] : memref<4x128xbf16, #tpu.memory_space<vmem>>, vector<4x128xbf16>
    %cst = arith.constant dense<0.000000e+00> : vector<16x128xf32>
    %2 = tpu.matmul %0, %1, %cst {dimension_numbers = #tpu.dot_dimension_numbers<[1], [0], [0], [1], [0, 0, 1, 1], [], []>} : vector<16x4xbf16>, vector<4x128xbf16>, vector<16x128xf32> -> vector<16x128xf32>
    %c0_3 = arith.constant 0 : index
    %c0_4 = arith.constant 0 : index
    %3 = vector.load %arg0[%c0_3, %c0_4] : memref<16x16xbf16, #tpu.memory_space<vmem>>, vector<16x16xbf16>
    %4 = arith.truncf %2 : vector<16x128xf32> to vector<16x128xbf16>
    %cst_5 = arith.constant dense<0.000000e+00> : vector<16x128xf32>
    %5 = tpu.matmul %3, %4, %cst_5 {dimension_numbers = #tpu.dot_dimension_numbers<[1], [0], [0], [1], [0, 0, 1, 1], [], []>} : vector<16x16xbf16>, vector<16x128xbf16>, vector<16x128xf32> -> vector<16x128xf32>
    %c0_6 = arith.constant 0 : index
    %c0_7 = arith.constant 0 : index
    %6 = vector.load %arg3[%c0_6, %c0_7] : memref<1x128xf32, #tpu.memory_space<vmem>>, vector<1x128xf32>
    %7 = vector.broadcast %6 : vector<1x128xf32> to vector<16x128xf32>
    %8 = arith.addf %5, %7 : vector<16x128xf32>
    %cst_8 = arith.constant 0.000000e+00 : f32
    %9 = vector.broadcast %cst_8 : f32 to vector<16x128xf32>
    %10 = arith.maximumf %8, %9 : vector<16x128xf32>
    %11 = arith.truncf %10 : vector<16x128xf32> to vector<16x128xbf16>
    %c0_9 = arith.constant 0 : index
    %c0_10 = arith.constant 0 : index
    %12 = vector.load %arg12[%c0_9, %c0_10] : memref<16x128xbf16, #tpu.memory_space<vmem>>, vector<16x128xbf16>
    tpu.vector_store %arg12[%c0_9, %c0_10], %11 {strides = array<i32>} : memref<16x128xbf16, #tpu.memory_space<vmem>>, vector<16x128xbf16>,
    %c0_i32 = arith.constant 0 : i32
    %c0_11 = arith.constant 0 : index
    %c0_12 = arith.constant 0 : index
    %13 = vector.load %arg12[%c0_11, %c0_12] : memref<16x128xbf16, #tpu.memory_space<vmem>>, vector<16x128xbf16>
    %14 = arith.index_cast %c0_i32 : i32 to index
    %c0_13 = arith.constant 0 : index
    %c0_14 = arith.constant 0 : index
    %15 = vector.load %arg4[%14, %c0_13, %c0_14] : memref<2x128x128xbf16, #tpu.memory_space<vmem>>, vector<1x128x128xbf16>
    %16 = vector.shape_cast %15 : vector<1x128x128xbf16> to vector<128x128xbf16>
    %cst_15 = arith.constant dense<0.000000e+00> : vector<16x128xf32>
    %17 = tpu.matmul %13, %16, %cst_15 {dimension_numbers = #tpu.dot_dimension_numbers<[1], [0], [0], [1], [0, 0, 1, 1], [], []>} : vector<16x128xbf16>, vector<128x128xbf16>, vector<16x128xf32> -> vector<16x128xf32>
    %c0_16 = arith.constant 0 : index
    %c0_17 = arith.constant 0 : index
    %18 = vector.load %arg0[%c0_16, %c0_17] : memref<16x16xbf16, #tpu.memory_space<vmem>>, vector<16x16xbf16>
    %19 = arith.truncf %17 : vector<16x128xf32> to vector<16x128xbf16>
    %cst_18 = arith.constant dense<0.000000e+00> : vector<16x128xf32>
    %20 = tpu.matmul %18, %19, %cst_18 {dimension_numbers = #tpu.dot_dimension_numbers<[1], [0], [0], [1], [0, 0, 1, 1], [], []>} : vector<16x16xbf16>, vector<16x128xbf16>, vector<16x128xf32> -> vector<16x128xf32>
    %21 = arith.index_cast %c0_i32 : i32 to index
    %c0_19 = arith.constant 0 : index
    %c0_20 = arith.constant 0 : index
    %22 = vector.load %arg5[%21, %c0_19, %c0_20] : memref<2x1x128xf32, #tpu.memory_space<vmem>>, vector<1x1x128xf32>
    %23 = vector.shape_cast %22 : vector<1x1x128xf32> to vector<1x128xf32>
    %24 = vector.broadcast %23 : vector<1x128xf32> to vector<16x128xf32>
    %25 = arith.addf %20, %24 : vector<16x128xf32>
    %cst_21 = arith.constant 0.000000e+00 : f32
    %26 = vector.broadcast %cst_21 : f32 to vector<16x128xf32>
    %27 = arith.maximumf %25, %26 : vector<16x128xf32>
    %28 = arith.truncf %27 : vector<16x128xf32> to vector<16x128xbf16>
    %c0_22 = arith.constant 0 : index
    %c0_23 = arith.constant 0 : index
    %29 = vector.load %arg12[%c0_22, %c0_23] : memref<16x128xbf16, #tpu.memory_space<vmem>>, vector<16x128xbf16>
    tpu.vector_store %arg12[%c0_22, %c0_23], %28 {strides = array<i32>} : memref<16x128xbf16, #tpu.memory_space<vmem>>, vector<16x128xbf16>,
    %c1_i32 = arith.constant 1 : i32
    %c0_24 = arith.constant 0 : index
    %c0_25 = arith.constant 0 : index
    %30 = vector.load %arg12[%c0_24, %c0_25] : memref<16x128xbf16, #tpu.memory_space<vmem>>, vector<16x128xbf16>
    %31 = arith.index_cast %c1_i32 : i32 to index
    %c0_26 = arith.constant 0 : index
    %c0_27 = arith.constant 0 : index
    %32 = vector.load %arg4[%31, %c0_26, %c0_27] : memref<2x128x128xbf16, #tpu.memory_space<vmem>>, vector<1x128x128xbf16>
    %33 = vector.shape_cast %32 : vector<1x128x128xbf16> to vector<128x128xbf16>
    %cst_28 = arith.constant dense<0.000000e+00> : vector<16x128xf32>
    %34 = tpu.matmul %30, %33, %cst_28 {dimension_numbers = #tpu.dot_dimension_numbers<[1], [0], [0], [1], [0, 0, 1, 1], [], []>} : vector<16x128xbf16>, vector<128x128xbf16>, vector<16x128xf32> -> vector<16x128xf32>
    %c0_29 = arith.constant 0 : index
    %c0_30 = arith.constant 0 : index
    %35 = vector.load %arg0[%c0_29, %c0_30] : memref<16x16xbf16, #tpu.memory_space<vmem>>, vector<16x16xbf16>
    %36 = arith.truncf %34 : vector<16x128xf32> to vector<16x128xbf16>
    %cst_31 = arith.constant dense<0.000000e+00> : vector<16x128xf32>
    %37 = tpu.matmul %35, %36, %cst_31 {dimension_numbers = #tpu.dot_dimension_numbers<[1], [0], [0], [1], [0, 0, 1, 1], [], []>} : vector<16x16xbf16>, vector<16x128xbf16>, vector<16x128xf32> -> vector<16x128xf32>
    %38 = arith.index_cast %c1_i32 : i32 to index
    %c0_32 = arith.constant 0 : index
    %c0_33 = arith.constant 0 : index
    %39 = vector.load %arg5[%38, %c0_32, %c0_33] : memref<2x1x128xf32, #tpu.memory_space<vmem>>, vector<1x1x128xf32>
    %40 = vector.shape_cast %39 : vector<1x1x128xf32> to vector<1x128xf32>
    %41 = vector.broadcast %40 : vector<1x128xf32> to vector<16x128xf32>
    %42 = arith.addf %37, %41 : vector<16x128xf32>
    %cst_34 = arith.constant 0.000000e+00 : f32
    %43 = vector.broadcast %cst_34 : f32 to vector<16x128xf32>
    %44 = arith.maximumf %42, %43 : vector<16x128xf32>
    %45 = arith.truncf %44 : vector<16x128xf32> to vector<16x128xbf16>
    %c0_35 = arith.constant 0 : index
    %c0_36 = arith.constant 0 : index
    %46 = vector.load %arg12[%c0_35, %c0_36] : memref<16x128xbf16, #tpu.memory_space<vmem>>, vector<16x128xbf16>
    tpu.vector_store %arg12[%c0_35, %c0_36], %45 {strides = array<i32>} : memref<16x128xbf16, #tpu.memory_space<vmem>>, vector<16x128xbf16>,
    %c2_i32 = arith.constant 2 : i32
    %c0_37 = arith.constant 0 : index
    %c0_38 = arith.constant 0 : index
    %47 = vector.load %arg6[%c0_37, %c0_38] : memref<8x16xbf16, #tpu.memory_space<vmem>>, vector<8x16xbf16>
    %c0_39 = arith.constant 0 : index
    %c0_40 = arith.constant 0 : index
    %48 = vector.load %arg12[%c0_39, %c0_40] : memref<16x128xbf16, #tpu.memory_space<vmem>>, vector<16x128xbf16>
    %cst_41 = arith.constant dense<0.000000e+00> : vector<8x128xf32>
    %49 = tpu.matmul %47, %48, %cst_41 {dimension_numbers = #tpu.dot_dimension_numbers<[1], [0], [0], [1], [0, 0, 1, 1], [], []>} : vector<8x16xbf16>, vector<16x128xbf16>, vector<8x128xf32> -> vector<8x128xf32>
    %50 = arith.truncf %49 : vector<8x128xf32> to vector<8x128xbf16>
    %c0_42 = arith.constant 0 : index
    %c0_43 = arith.constant 0 : index
    %51 = vector.load %arg7[%c0_42, %c0_43] : memref<128x128xbf16, #tpu.memory_space<vmem>>, vector<128x128xbf16>
    %cst_44 = arith.constant dense<0.000000e+00> : vector<8x128xf32>
    %52 = tpu.matmul %50, %51, %cst_44 {dimension_numbers = #tpu.dot_dimension_numbers<[1], [0], [0], [1], [0, 0, 1, 1], [], []>} : vector<8x128xbf16>, vector<128x128xbf16>, vector<8x128xf32> -> vector<8x128xf32>
    %c0_45 = arith.constant 0 : index
    %c0_46 = arith.constant 0 : index
    %53 = vector.load %arg8[%c0_45, %c0_46] : memref<1x128xf32, #tpu.memory_space<vmem>>, vector<1x128xf32>
    %54 = vector.broadcast %53 : vector<1x128xf32> to vector<8x128xf32>
    %55 = arith.addf %52, %54 : vector<8x128xf32>
    %cst_47 = arith.constant 0.000000e+00 : f32
    %56 = vector.broadcast %cst_47 : f32 to vector<8x128xf32>
    %57 = arith.maximumf %55, %56 : vector<8x128xf32>
    %58 = arith.truncf %57 : vector<8x128xf32> to vector<8x128xbf16>
    %c0_48 = arith.constant 0 : index
    %c0_49 = arith.constant 0 : index
    %59 = vector.load %arg9[%c0_48, %c0_49] : memref<128x128xbf16, #tpu.memory_space<vmem>>, vector<128x128xbf16>
    %cst_50 = arith.constant dense<0.000000e+00> : vector<8x128xf32>
    %60 = tpu.matmul %58, %59, %cst_50 {dimension_numbers = #tpu.dot_dimension_numbers<[1], [0], [0], [1], [0, 0, 1, 1], [], []>} : vector<8x128xbf16>, vector<128x128xbf16>, vector<8x128xf32> -> vector<8x128xf32>
    %c0_51 = arith.constant 0 : index
    %c0_52 = arith.constant 0 : index
    %61 = vector.load %arg10[%c0_51, %c0_52] : memref<1x128xf32, #tpu.memory_space<vmem>>, vector<1x128xf32>
    %62 = vector.broadcast %61 : vector<1x128xf32> to vector<8x128xf32>
    %63 = arith.addf %60, %62 : vector<8x128xf32>
    %c0_53 = arith.constant 0 : index
    %c0_54 = arith.constant 0 : index
    %64 = vector.load %arg11[%c0_53, %c0_54] : memref<8x128xf32, #tpu.memory_space<vmem>>, vector<8x128xf32>
    tpu.vector_store %arg11[%c0_53, %c0_54], %63 {strides = array<i32>} : memref<8x128xf32, #tpu.memory_space<vmem>>, vector<8x128xf32>,
    return
  }
}

</mosaic_0001>

<bundles_post_ra>
// kernel: _forward_resident.1
= control target key start
LH: loop header
LB: loop body
LE: loop exit
PB: predicated region body
PF: predicated region fallthrough
CT: control target
= control target key end

     0   :  { %16 = vsyncpa [#allocation4], 0  ;;  %s1389_s0 = inlined_call_operand.vmem [shape: bf16[16,16], index: 0, kind: input, shape index: {}]   ;;  %s1390_s1 = inlined_call_operand.vmem [shape: bf16[16,4], index: 1, kind: input, shape index: {}]   ;;  %s1391_s2 = inlined_call_operand.vmem [shape: bf16[4,128], index: 2, kind: input, shape index: {}]   ;;  %s1392_s3 = inlined_call_operand.hbm [shape: f32[1,128], index: 3, kind: input, shape index: {}]   ;;  %s1393_s4 = inlined_call_operand.hbm [shape: bf16[2,128,128], index: 4, kind: input, shape index: {}]   ;;  %s1394_s5 = inlined_call_operand.vmem [shape: f32[2,1,128], index: 5, kind: input, shape index: {}]   ;;  %s1395_s6 = inlined_call_operand.vmem [shape: bf16[8,16], index: 6, kind: input, shape index: {}]   ;;  %s1396_s7 = inlined_call_operand.hbm [shape: bf16[128,128], index: 7, kind: input, shape index: {}]   ;;  %s1397_s8 = inlined_call_operand.vmem [shape: f32[1,128], index: 8, kind: input, shape index: {}]   ;;  %s1398_s9 = inlined_call_operand.hbm [shape: bf16[128,128], index: 9, kind: input, shape index: {}]   ;;  %s1399_s10 = inlined_call_operand.vmem [shape: f32[1,128], index: 10, kind: input, shape index: {}]   ;;  %s1400_s11 = inlined_call_operand.vmem [shape: f32[8,128], index: 11, kind: output, shape index: {}]  }
   0x1   :  { %17 = vsyncpa [#allocation6], 0 }
   0x2   :  { %18 = vsyncpa [#allocation9], 0  ;;  %s1172_s17 = smov [#allocation5]   ;;  %s1078_s21 = scalar_lea.hbm %s1393_s4, 2048 }
   0x3   :  { %s40_s18 = sshll.u32 %s1172_s17, 4  ;;  %p1079_p0 = scmp.ne.s32.totalorder %s1393_s4, %s1078_s21  ;;  %s41_s18 = int_to_ptr.vmem [resolvable:$true] %s40_s18 }
   0x4   :  { %p1082_p1 = scmp.lt.u32.totalorder %s1078_s21, %s1393_s4 }
   0x6   :  { %p1084_p2 = pnand %p1082_p1, %p1079_p0 }
   0x8   :  { %1087 = shalt.err (!%p1084_p2)
}
   0x9   :  { %s1088_s26 = scalar_lea.vmem %s41_s18, 2048  ;;  %p1093_p4 = scmp.lt.s32.totalorder %s41_s18, %s41_s18 }
   0xa   :  { %p1089_p3 = scmp.ne.s32.totalorder %s41_s18, %s1088_s26  ;;  %p1094_p5 = scmp.lt.s32.totalorder %s1088_s26, %s1088_s26 }
   0xc   :  { %p1095_p6 = por %p1094_p5, %p1093_p4 }
   0xe   :  { %p1096_p7 = pnand %p1095_p6, %p1089_p3 }
  0x10   :  { %1099 = shalt.err (!%p1096_p7)
}
  0x11   :  { %s1173_s27 = smov 64   ;;  %s1174_s28 = smov 4  }
  0x12   :  { %46 = dma.hbm_to_vmem [thread:$0]  %s1393_s4, 2048, %s41_s18, [#allocation6], %s1173_s27, %s1173_s27, %s1174_s28  }
  0x13   :  { %s1175_s12 = smov [#allocation3]   ;;  %s1176_s14 = smov [#allocation7]  }
  0x14   :  { %s31_s13 = sshll.u32 %s1175_s12, 4  ;;  %s56_s15 = sshll.u32 %s1176_s14, 4  ;;  %s32_s13 = int_to_ptr.vmem [resolvable:$true] %s31_s13  ;;  %s57_s15 = int_to_ptr.vmem [resolvable:$true] %s56_s15 }
  0x15   :  { %s1100_s19 = scalar_lea.hbm %s1392_s3, 16 }
  0x16   :  { %p1101_p8 = scmp.ne.s32.totalorder %s1392_s3, %s1100_s19  ;;  %p1104_p9 = scmp.lt.u32.totalorder %s1100_s19, %s1392_s3 }
  0x18   :  { %p1106_p10 = pnand %p1104_p9, %p1101_p8 }
  0x1a   :  { %1109 = shalt.err (!%p1106_p10)
}
  0x1b   :  { %s1110_s4 = scalar_lea.vmem %s32_s13, 16  ;;  %s1114_s18 = scalar_lea.vmem %s32_s13, 32 }
  0x1c   :  { %p1111_p11 = scmp.ne.s32.totalorder %s32_s13, %s1110_s4  ;;  %p1115_p12 = scmp.lt.s32.totalorder %s32_s13, %s32_s13 }
  0x1d   :  { %p1116_p13 = scmp.lt.s32.totalorder %s1114_s18, %s1110_s4 }
  0x1f   :  { %p1117_p0 = por %p1116_p13, %p1115_p12 }
  0x21   :  { %p1118_p1 = pnand %p1117_p0, %p1111_p11 }
  0x23   :  { %1121 = shalt.err (!%p1118_p1)
}
  0x24   :  { %34 = dma.hbm_to_vmem [thread:$0]  %s1392_s3, 16, %s32_s13, [#allocation4]  }
  0x25   :  { %s1122_s30 = scalar_lea.hbm %s1396_s7, 1024 }
  0x26   :  { %p1123_p2 = scmp.ne.s32.totalorder %s1396_s7, %s1122_s30  ;;  %p1126_p3 = scmp.lt.u32.totalorder %s1122_s30, %s1396_s7 }
  0x28   :  { %p1128_p4 = pnand %p1126_p3, %p1123_p2 }
  0x2a   :  { %1131 = shalt.err (!%p1128_p4)
}
  0x2b   :  { %s1132_s19 = scalar_lea.vmem %s57_s15, 1024  ;;  %p1137_p6 = scmp.lt.s32.totalorder %s57_s15, %s57_s15 }
  0x2c   :  { %p1133_p5 = scmp.ne.s32.totalorder %s57_s15, %s1132_s19  ;;  %p1138_p7 = scmp.lt.s32.totalorder %s1132_s19, %s1132_s19 }
  0x2e   :  { %p1139_p8 = por %p1138_p7, %p1137_p6 }
  0x30   :  { %p1140_p9 = pnand %p1139_p8, %p1133_p5 }
  0x32   :  { %1143 = shalt.err (!%p1140_p9)
}
  0x33   :  { %62 = dma.hbm_to_vmem [thread:$0]  %s1396_s7, 1024, %s57_s15, [#allocation6], %s1173_s27, %s1173_s27, %s1174_s28  }
  0x34   :  { %s1177_s20 = smov [#allocation8]   ;;  %s1144_s4 = scalar_lea.hbm %s1398_s9, 1024 }
  0x35   :  { %s70_s21 = sshll.u32 %s1177_s20, 4  ;;  %p1145_p10 = scmp.ne.s32.totalorder %s1398_s9, %s1144_s4  ;;  %s71_s21 = int_to_ptr.vmem [resolvable:$true] %s70_s21 }
  0x36   :  { %p1148_p11 = scmp.lt.u32.totalorder %s1144_s4, %s1398_s9 }
  0x38   :  { %p1150_p12 = pnand %p1148_p11, %p1145_p10 }
  0x3a   :  { %1153 = shalt.err (!%p1150_p12)
}
  0x3b   :  { %s1154_s29 = scalar_lea.vmem %s71_s21, 1024  ;;  %p1159_p0 = scmp.lt.s32.totalorder %s71_s21, %s71_s21 }
  0x3c   :  { %p1155_p13 = scmp.ne.s32.totalorder %s71_s21, %s1154_s29  ;;  %p1160_p1 = scmp.lt.s32.totalorder %s1154_s29, %s1154_s29 }
  0x3e   :  { %p1161_p2 = por %p1160_p1, %p1159_p0 }
  0x40   :  { %p1162_p3 = pnand %p1161_p2, %p1155_p13 }
  0x42   :  { %1165 = shalt.err (!%p1162_p3)
}
  0x43   :  { %76 = dma.hbm_to_vmem [thread:$0]  %s1398_s9, 1024, %s71_s21, [#allocation9], %s1173_s27, %s1173_s27, %s1174_s28  }
  0x44   :  { %1166 = dma.done.wait [#allocation4], 16  }
  0x45   :  { %1167 = vsyncadd [#allocation4], 4294967280 }
  0x46   :  { %1168 = dma.done.wait [#allocation6], 3072  }
  0x47   :  { %1169 = vsyncadd [#allocation6], 4294964224 }
  0x48   :  { %1170 = dma.done.wait [#allocation9], 1024  }
  0x49   :  { %1171 = vsyncadd [#allocation9], 4294966272  ;;  %v1178_v0 = vmov 0.0   ;;  %vm1179_vm0 = vmmov 0   ;;  %vm104_vm1 = vcmask 1041408   ;;  %vm100_vm2 = vcmask 31744  }
  0x4a   :  { %924 = vmatprep.subr.bf16.mxu0 %v1178_v0  ;;  %926 = vmatprep.mubr.msk.bf16.mxu0 %vm1179_vm0, %v1178_v0  ;;  %v94_v1 = vld [vmem:[%s1391_s2] sm:$0x3]  ;;  %v1044_v4 = vld [vmem:[#allocation5] sm:$0xff]   ;;  %v1045_v5 = vld [vmem:[#allocation5 + $0x8] sm:$0xff]   ;;  %vm164_vm3 = vcmask 130048  }
  0x4b   :  { %930 = vmatprep.subr.bf16.mxu1 %v1178_v0  ;;  %932 = vmatprep.mubr.msk.bf16.mxu1 %vm1179_vm0, %v1178_v0  ;;  %v106_v2 = vsel %vm104_vm1, %v94_v1, 0  ;;  %v1042_v3 = vld [vmem:[%s1390_s1] sm:$0xff]   ;;  %v1046_v6 = vld [vmem:[#allocation5 + $0x10] sm:$0xff]   ;;  %v1049_v9 = vld [vmem:[#allocation5 + $0x28] sm:$0xff]  }
  0x4c   :  { %925 = vmatpush3.bf16.msra.mxu0 %v106_v2  ;;  %v1047_v7 = vld [vmem:[#allocation5 + $0x18] sm:$0xff]   ;;  %v1048_v8 = vld [vmem:[#allocation5 + $0x20] sm:$0xff]   ;;  %v1050_v16 = vld [vmem:[#allocation5 + $0x30] sm:$0xff]  }
  0x4d   :  { %936 = vmatprep.subr.bf16.mxu0 %v1178_v0  ;;  %v1043_v15 = vld [vmem:[%s1389_s0] sm:$0xff]   ;;  %v1054_v35 = vld [vmem:[#allocation5 + $0x48] sm:$0xff]   ;;  %v1055_v36 = vld [vmem:[#allocation5 + $0x50] sm:$0xff]  }
  0x4e   :  { %v1051_v17 = vld [vmem:[#allocation5 + $0x38] sm:$0xff]   ;;  %v1053_v34 = vld [vmem:[#allocation5 + $0x40] sm:$0xff]   ;;  %v1058_v39 = vld [vmem:[#allocation5 + $0x68] sm:$0xff]  }
  0x4f   :  { %927 = vmatmul.mubr.msk.bf16.vlgmr.msra.gmra.mrb[0].mxu0 %vm100_vm2, %v1042_v3  ;;  %v833_v18 = vld [vmem:[#allocation3] ss:$0 sm:$0xff]  ;;  %v1057_v38 = vld [vmem:[#allocation5 + $0x60] sm:$0xff]   ;;  %v1059_v40 = vld [vmem:[#allocation5 + $0x70] sm:$0xff]  }
  0x50   :  { %952 = vmatprep.mubr.msk.bf16.mxu0 %vm1179_vm0, %v1178_v0  ;;  %937 = vmatpush3.bf16.msra.mxu0 %v1044_v4  ;;  %v1052_v33 = vld [vmem:[%s1389_s0] sm:$0xff]   ;;  %v1063_v59 = vld [vmem:[#allocation7 + $0x8] sm:$0xff]   ;;  %v1064_v60 = vld [vmem:[#allocation7 + $0x10] sm:$0xff]  }
  0x51   :  { %938 = vmatprep.subr.bf16.mxu0 %v1178_v0  ;;  %v1056_v37 = vld [vmem:[#allocation5 + $0x58] sm:$0xff]   ;;  %v1062_v58 = vld [vmem:[#allocation7] sm:$0xff]   ;;  %v1067_v63 = vld [vmem:[#allocation7 + $0x28] sm:$0xff]  }
  0x52   :  { %v1060_v41 = vld [vmem:[#allocation5 + $0x78] sm:$0xff]   ;;  %v1066_v62 = vld [vmem:[#allocation7 + $0x20] sm:$0xff]   ;;  %v1068_v1 = vld [vmem:[#allocation7 + $0x30] sm:$0xff]  }
  0x53   :  { %v844_v42 = vld [vmem:[%s1394_s5] ss:$0 sm:$0xff]  ;;  %v856_v2 = vld [vmem:[%s1394_s5 + $0x1] ss:$0 sm:$0xff] }
  0x54   :  { %939 = vmatpush3.bf16.msra.mxu0 %v1045_v5  ;;  %v1061_v57 = vld [vmem:[%s1389_s0] sm:$0xff]  }
  0x55   :  { %940 = vmatprep.subr.bf16.mxu0 %v1178_v0  ;;  %v1065_v61 = vld [vmem:[#allocation7 + $0x18] sm:$0xff]  }
  0x58   :  { %941 = vmatpush3.bf16.msra.mxu0 %v1046_v6 }
  0x59   :  { %942 = vmatprep.subr.bf16.mxu0 %v1178_v0 }
  0x5c   :  { %943 = vmatpush3.bf16.msra.mxu0 %v1047_v7 }
  0x5d   :  { %944 = vmatprep.subr.bf16.mxu0 %v1178_v0 }
  0x60   :  { %945 = vmatpush3.bf16.msra.mxu0 %v1048_v8 }
  0x61   :  { %946 = vmatprep.subr.bf16.mxu0 %v1178_v0 }
  0x64   :  { %947 = vmatpush3.bf16.msra.mxu0 %v1049_v9 }
  0x65   :  { %948 = vmatprep.subr.bf16.mxu0 %v1178_v0 }
  0x68   :  { %949 = vmatpush3.bf16.msra.mxu0 %v1050_v16  ;;  %v1072_v16 = vld [vmem:[#allocation8 + $0x10] sm:$0xff]  }
  0x69   :  { %950 = vmatprep.subr.bf16.mxu0 %v1178_v0 }
  0x6c   :  { %951 = vmatpush3.bf16.msra.mxu0 %v1051_v17  ;;  %v1073_v17 = vld [vmem:[#allocation8 + $0x18] sm:$0xff]  }
  0x6d   :  { %982 = vmatprep.subr.bf16.mxu0 %v1178_v0 }
 0x122   :  { %v142_v10 = vpop.f32.mrb[0].mxu0 }
 0x123   :  { %v928_v11 = vpop.f32.mrb[1].mxu0 }
 0x124   :  { %v145_v12 = vpop.f32.mrb[2].mxu0 }
 0x125   :  { %v151_v13 = vpack.c.bf16 %v145_v12, %v142_v10  ;;  %v929_v14 = vpop.f32.mrb[3].mxu0  ;;  %v553_v12 = vld [vmem:[%s1395_s6] sm:$0xf] }
 0x126   :  { %v1070_v14 = vld [vmem:[#allocation8] sm:$0xff]  }
 0x127   :  { %931 = vmatpush3.bf16.msra.mxu1 %v151_v13  ;;  %v1069_v13 = vld [vmem:[#allocation7 + $0x38] sm:$0xff]  }
 0x128   :  { %956 = vmatprep.subr.bf16.mxu1 %v1178_v0 }
 0x12a   :  { %933 = vmatmul.mubr.msk.bf16.vlgmr.msra.gmra.mrb[0].mxu1 %vm164_vm3, %v1043_v15  ;;  %v1071_v15 = vld [vmem:[#allocation8 + $0x8] sm:$0xff]  }
 0x12b   :  { %958 = vmatprep.mubr.msk.bf16.mxu1 %vm1179_vm0, %v1178_v0 }
 0x1fd   :  { %v202_v19 = vpop.f32.mrb[0].mxu1 }
 0x1fe   :  { %v203_v20 = vadd.f32 %v833_v18, %v202_v19  ;;  %v934_v21 = vpop.f32.mrb[1].mxu1  ;;  %v1075_v19 = vld [vmem:[#allocation8 + $0x28] sm:$0xff]  }
 0x1ff   :  { %v205_v22 = vpop.f32.mrb[2].mxu1 }
 0x200   :  { %v206_v23 = vadd.f32 %v833_v18, %v205_v22  ;;  %v935_v24 = vpop.f32.mrb[3].mxu1  ;;  %v209_v25 = vmax.f32 %v203_v20, 0.0  ;;  %v1074_v18 = vld [vmem:[#allocation8 + $0x20] sm:$0xff]  }
 0x202   :  { %v210_v26 = vmax.f32 %v206_v23, 0.0 }
 0x204   :  { %v211_v27 = vpack.c.bf16 %v210_v26, %v209_v25  ;;  %v1076_v25 = vld [vmem:[#allocation8 + $0x30] sm:$0xff]   ;;  %v1077_v26 = vld [vmem:[#allocation8 + $0x38] sm:$0xff]  }
 0x206   :  { %953 = vmatmul.mubr.bf16.vlgmr.msra.gmra.mrb[4].mxu0 %v211_v27  ;;  %v860_v27 = vld [vmem:[%s1397_s8] ss:$0 sm:$0xff] }
 0x207   :  { %984 = vmatprep.mubr.msk.bf16.mxu0 %vm1179_vm0, %v1178_v0 }
 0x2d9   :  { %v312_v28 = vpop.f32.mrb[4].mxu0 }
 0x2da   :  { %v954_v29 = vpop.f32.mrb[5].mxu0 }
 0x2db   :  { %v315_v30 = vpop.f32.mrb[6].mxu0 }
 0x2dc   :  { %v321_v31 = vpack.c.bf16 %v315_v30, %v312_v28  ;;  %v955_v32 = vpop.f32.mrb[7].mxu0 }
 0x2de   :  { %957 = vmatpush3.bf16.msra.mxu1 %v321_v31 }
 0x2df   :  { %962 = vmatprep.subr.bf16.mxu1 %v1178_v0 }
 0x2e1   :  { %959 = vmatmul.mubr.msk.bf16.vlgmr.msra.gmra.mrb[4].mxu1 %vm164_vm3, %v1052_v33 }
 0x2e2   :  { %963 = vmatpush3.bf16.msra.mxu1 %v1053_v34  ;;  %978 = vmatprep.mubr.msk.bf16.mxu1 %vm1179_vm0, %v1178_v0 }
 0x2e3   :  { %964 = vmatprep.subr.bf16.mxu1 %v1178_v0 }
 0x2e6   :  { %965 = vmatpush3.bf16.msra.mxu1 %v1054_v35  ;;  %v869_v35 = vld [vmem:[%s1399_s10] ss:$0 sm:$0xff] }
 0x2e7   :  { %966 = vmatprep.subr.bf16.mxu1 %v1178_v0 }
 0x2ea   :  { %967 = vmatpush3.bf16.msra.mxu1 %v1055_v36 }
 0x2eb   :  { %968 = vmatprep.subr.bf16.mxu1 %v1178_v0 }
 0x2ee   :  { %969 = vmatpush3.bf16.msra.mxu1 %v1056_v37 }
 0x2ef   :  { %970 = vmatprep.subr.bf16.mxu1 %v1178_v0 }
 0x2f2   :  { %971 = vmatpush3.bf16.msra.mxu1 %v1057_v38 }
 0x2f3   :  { %972 = vmatprep.subr.bf16.mxu1 %v1178_v0 }
 0x2f6   :  { %973 = vmatpush3.bf16.msra.mxu1 %v1058_v39 }
 0x2f7   :  { %974 = vmatprep.subr.bf16.mxu1 %v1178_v0 }
 0x2fa   :  { %975 = vmatpush3.bf16.msra.mxu1 %v1059_v40 }
 0x2fb   :  { %976 = vmatprep.subr.bf16.mxu1 %v1178_v0 }
 0x2fe   :  { %977 = vmatpush3.bf16.msra.mxu1 %v1060_v41 }
 0x2ff   :  { %994 = vmatprep.subr.bf16.mxu1 %v1178_v0 }
 0x3b4   :  { %v371_v43 = vpop.f32.mrb[4].mxu1 }
 0x3b5   :  { %v372_v44 = vadd.f32 %v844_v42, %v371_v43  ;;  %v960_v45 = vpop.f32.mrb[5].mxu1 }
 0x3b6   :  { %v374_v46 = vpop.f32.mrb[6].mxu1 }
 0x3b7   :  { %v375_v47 = vadd.f32 %v844_v42, %v374_v46  ;;  %v961_v48 = vpop.f32.mrb[7].mxu1  ;;  %v378_v49 = vmax.f32 %v372_v44, 0.0 }
 0x3b9   :  { %v379_v50 = vmax.f32 %v375_v47, 0.0 }
 0x3bb   :  { %v380_v51 = vpack.c.bf16 %v379_v50, %v378_v49 }
 0x3bd   :  { %979 = vmatmul.mubr.bf16.vlgmr.msra.gmra.mrb[8].mxu1 %v380_v51 }
 0x3be   :  { %1010 = vmatprep.mubr.msk.bf16.mxu1 %vm1179_vm0, %v1178_v0  ;;  %995 = vmatpush3.bf16.msra.mxu1 %v1062_v58 }
 0x3bf   :  { %996 = vmatprep.subr.bf16.mxu1 %v1178_v0 }
 0x3c2   :  { %997 = vmatpush3.bf16.msra.mxu1 %v1063_v59 }
 0x3c3   :  { %998 = vmatprep.subr.bf16.mxu1 %v1178_v0 }
 0x3c6   :  { %999 = vmatpush3.bf16.msra.mxu1 %v1064_v60 }
 0x3c7   :  { %1000 = vmatprep.subr.bf16.mxu1 %v1178_v0 }
 0x3ca   :  { %1001 = vmatpush3.bf16.msra.mxu1 %v1065_v61 }
 0x3cb   :  { %1002 = vmatprep.subr.bf16.mxu1 %v1178_v0 }
 0x3ce   :  { %1003 = vmatpush3.bf16.msra.mxu1 %v1066_v62 }
 0x3cf   :  { %1004 = vmatprep.subr.bf16.mxu1 %v1178_v0 }
 0x3d2   :  { %1005 = vmatpush3.bf16.msra.mxu1 %v1067_v63 }
 0x3d3   :  { %1006 = vmatprep.subr.bf16.mxu1 %v1178_v0 }
 0x3d6   :  { %1007 = vmatpush3.bf16.msra.mxu1 %v1068_v1 }
 0x3d7   :  { %1008 = vmatprep.subr.bf16.mxu1 %v1178_v0 }
 0x3da   :  { %1009 = vmatpush3.bf16.msra.mxu1 %v1069_v13 }
 0x490   :  { %v482_v52 = vpop.f32.mrb[8].mxu1 }
 0x491   :  { %v980_v53 = vpop.f32.mrb[9].mxu1 }
 0x492   :  { %v485_v54 = vpop.f32.mrb[10].mxu1 }
 0x493   :  { %v491_v55 = vpack.c.bf16 %v485_v54, %v482_v52  ;;  %v981_v56 = vpop.f32.mrb[11].mxu1 }
 0x495   :  { %983 = vmatpush3.bf16.msra.mxu0 %v491_v55 }
 0x496   :  { %988 = vmatprep.subr.bf16.mxu0 %v1178_v0 }
 0x498   :  { %985 = vmatmul.mubr.msk.bf16.vlgmr.msra.gmra.mrb[8].mxu0 %vm164_vm3, %v1061_v57 }
 0x499   :  { %990 = vmatprep.mubr.msk.bf16.mxu0 %vm1179_vm0, %v1178_v0 }
 0x56b   :  { %v542_v3 = vpop.f32.mrb[8].mxu0 }
 0x56c   :  { %v543_v4 = vadd.f32 %v856_v2, %v542_v3  ;;  %v986_v5 = vpop.f32.mrb[9].mxu0 }
 0x56d   :  { %v545_v6 = vpop.f32.mrb[10].mxu0 }
 0x56e   :  { %v546_v7 = vadd.f32 %v856_v2, %v545_v6  ;;  %v987_v8 = vpop.f32.mrb[11].mxu0  ;;  %v549_v9 = vmax.f32 %v543_v4, 0.0 }
 0x570   :  { %v550_v10 = vmax.f32 %v546_v7, 0.0 }
 0x572   :  { %v551_v11 = vpack.c.bf16 %v550_v10, %v549_v9 }
 0x574   :  { %989 = vmatpush3.bf16.msra.mxu0 %v551_v11 }
 0x575   :  { %1014 = vmatprep.subr.bf16.mxu0 %v1178_v0 }
 0x577   :  { %991 = vmatmul.mubr.msk.bf16.vlgmr.msra.gmra.mrb[12].mxu0 %vm164_vm3, %v553_v12 }
 0x578   :  { %1030 = vmatprep.mubr.msk.bf16.mxu0 %vm1179_vm0, %v1178_v0  ;;  %1015 = vmatpush3.bf16.msra.mxu0 %v1070_v14 }
 0x579   :  { %1016 = vmatprep.subr.bf16.mxu0 %v1178_v0 }
 0x57c   :  { %1017 = vmatpush3.bf16.msra.mxu0 %v1071_v15 }
 0x57d   :  { %1018 = vmatprep.subr.bf16.mxu0 %v1178_v0 }
 0x580   :  { %1019 = vmatpush3.bf16.msra.mxu0 %v1072_v16 }
 0x581   :  { %1020 = vmatprep.subr.bf16.mxu0 %v1178_v0 }
 0x584   :  { %1021 = vmatpush3.bf16.msra.mxu0 %v1073_v17 }
 0x585   :  { %1022 = vmatprep.subr.bf16.mxu0 %v1178_v0 }
 0x588   :  { %1023 = vmatpush3.bf16.msra.mxu0 %v1074_v18 }
 0x589   :  { %1024 = vmatprep.subr.bf16.mxu0 %v1178_v0 }
 0x58c   :  { %1025 = vmatpush3.bf16.msra.mxu0 %v1075_v19 }
 0x58d   :  { %1026 = vmatprep.subr.bf16.mxu0 %v1178_v0 }
 0x590   :  { %1027 = vmatpush3.bf16.msra.mxu0 %v1076_v25 }
 0x591   :  { %1028 = vmatprep.subr.bf16.mxu0 %v1178_v0 }
 0x594   :  { %1029 = vmatpush3.bf16.msra.mxu0 %v1077_v26 }
 0x64a   :  { %v592_v20 = vpop.f32.mrb[12].mxu0 }
 0x64b   :  { %v598_v21 = vpack.c.bf16 %v592_v20, %v592_v20  ;;  %v992_v22 = vpop.f32.mrb[13].mxu0 }
 0x64c   :  { %v595_v23 = vpop.f32.mrb[14].mxu0 }
 0x64d   :  { %v993_v24 = vpop.f32.mrb[15].mxu0  ;;  %1011 = vmatmul.mubr.bf16.vlgmr.msra.gmra.mrb[12].mxu1 %v598_v21 }
 0x720   :  { %v704_v28 = vpop.f32.mrb[12].mxu1 }
 0x721   :  { %v705_v29 = vadd.f32 %v860_v27, %v704_v28  ;;  %v1012_v30 = vpop.f32.mrb[13].mxu1 }
 0x722   :  { %v707_v31 = vpop.f32.mrb[14].mxu1 }
 0x723   :  { %v710_v32 = vmax.f32 %v705_v29, 0.0  ;;  %v1013_v33 = vpop.f32.mrb[15].mxu1 }
 0x725   :  { %v711_v34 = vpack.c.bf16 %v710_v32, %v710_v32 }
 0x727   :  { %1031 = vmatmul.mubr.bf16.vlgmr.msra.gmra.mrb[16].mxu0 %v711_v34 }
 0x7fa   :  { %v817_v36 = vpop.f32.mrb[16].mxu0 }
 0x7fb   :  { %v818_v0 = vadd.f32 %v869_v35, %v817_v36  ;;  %v1032_v37 = vpop.f32.mrb[17].mxu0 }
 0x7fc   :  { %v820_v38 = vpop.f32.mrb[18].mxu0 }
 0x7fd   :  { %823 = vst [vmem:[%s1400_s11] sm:$0xff] %v818_v0  ;;  %v1033_v39 = vpop.f32.mrb[19].mxu0 }
 0x7fe   :  { %828 = vsyncpa [#allocation4], 1 }
 0x7ff   :  { %829 = vsyncpa [#allocation6], 1 }
 0x800   :  { %830 = vsyncpa [#allocation9], 1 }

</bundles_post_ra>
